<compile_context>
chip_gen: v7x
topology: tpu7x:2x2x1
jax: 0.10.0
libtpu: 0.0.40
codegen_flags: <defaults>
</compile_context>

<pallas_src>
import math
import functools

import jax
import jax.numpy as jnp
from jax import lax
from jax.experimental import pallas as pl
from jax.experimental.pallas import tpu as pltpu


def _round_up(x, m):
    return (x + m - 1) // m * m


def _tile(dim, target):
    """Pick (block_size, padded_extent) for one dim: full-extent block if small, else tiled."""
    if dim <= target:
        return dim, dim
    return target, _round_up(dim, target)


# ----------------------------- tiled matmul + bias -----------------------------

def _matmul_bias_kernel(x_ref, w_ref, b_ref, o_ref, acc_ref):
    # Multi-K-block path: f32 VMEM accumulator, init/finalize gated on the K grid axis.
    k = pl.program_id(2)

    @pl.when(k == 0)
    def _():
        acc_ref[...] = jnp.zeros_like(acc_ref)

    acc_ref[...] += jnp.dot(x_ref[...], w_ref[...],
                            preferred_element_type=jnp.float32)

    @pl.when(k == pl.num_programs(2) - 1)
    def _():
        o_ref[...] = (acc_ref[...] + b_ref[...].astype(jnp.float32)).astype(o_ref.dtype)


def _matmul_bias_1k_kernel(x_ref, w_ref, b_ref, o_ref):
    # Single-K-block path: no scratch, no phases — dot + bias, written once.
    acc = jnp.dot(x_ref[...], w_ref[...], preferred_element_type=jnp.float32)
    o_ref[...] = (acc + b_ref[...].astype(jnp.float32)).astype(o_ref.dtype)


def linear(x2d, w, b, *, tm=256, tn=256, tk=1024, out_dtype=None,
           compute_dtype=jnp.bfloat16):
    """x2d: (M, K), w: (K, N), b: (N,) -> x2d @ w + b via a tiled Pallas matmul."""
    M, K = x2d.shape
    Kw, N = w.shape
    assert K == Kw
    out_dtype = out_dtype or x2d.dtype

    # bf16 operands hit the native MXU rate (v6e/v7x 256x256, v5e 4x128^2) and halve HBM/VMEM
    # traffic; accumulation stays f32 via preferred_element_type.
    if compute_dtype is not None and x2d.dtype != compute_dtype:
        x2d = x2d.astype(compute_dtype)
    if compute_dtype is not None and w.dtype != compute_dtype:
        w = w.astype(compute_dtype)

    tm, Mp = _tile(M, tm)
    tn, Np = _tile(N, tn)
    tk, Kp = _tile(K, tk)

    # Zero-pad only when a dim exceeds its tile and doesn't divide (no-op at demo shapes and at
    # realistic 128-multiple channel counts).  Explicit zero padding keeps the K reduction exact.
    if (Mp, Kp) != (M, K):
        x2d = jnp.pad(x2d, ((0, Mp - M), (0, Kp - K)))
    if (Kp, Np) != (K, N):
        w = jnp.pad(w, ((0, Kp - K), (0, Np - N)))
    b2 = b.reshape(1, N).astype(jnp.float32)
    if Np != N:
        b2 = jnp.pad(b2, ((0, 0), (0, Np - N)))

    nk = Kp // tk
    cost = pl.CostEstimate(
        flops=2 * M * N * K,
        transcendentals=0,
        bytes_accessed=(x2d.dtype.itemsize * M * K + w.dtype.itemsize * K * N
                        + jnp.dtype(out_dtype).itemsize * M * N))

    if nk == 1:
        out = pl.pallas_call(
            _matmul_bias_1k_kernel,
            out_shape=jax.ShapeDtypeStruct((Mp, Np), out_dtype),
            grid=(Mp // tm, Np // tn),
            in_specs=[
                pl.BlockSpec((tm, Kp), lambda i, j: (i, 0)),
                pl.BlockSpec((Kp, tn), lambda i, j: (0, j)),
                pl.BlockSpec((1, tn), lambda i, j: (0, j)),
            ],
            out_specs=pl.BlockSpec((tm, tn), lambda i, j: (i, j)),
            compiler_params=pltpu.CompilerParams(
                dimension_semantics=("parallel", "parallel")),
            cost_estimate=cost,
        )(x2d, w, b2)
    else:
        out = pl.pallas_call(
            _matmul_bias_kernel,
            out_shape=jax.ShapeDtypeStruct((Mp, Np), out_dtype),
            grid=(Mp // tm, Np // tn, nk),
            in_specs=[
                pl.BlockSpec((tm, tk), lambda i, j, k: (i, k)),
                pl.BlockSpec((tk, tn), lambda i, j, k: (k, j)),
                pl.BlockSpec((1, tn), lambda i, j, k: (0, j)),
            ],
            out_specs=pl.BlockSpec((tm, tn), lambda i, j, k: (i, j)),
            scratch_shapes=[pltpu.VMEM((tm, tn), jnp.float32)],
            compiler_params=pltpu.CompilerParams(
                dimension_semantics=("parallel", "parallel", "arbitrary")),
            cost_estimate=cost,
        )(x2d, w, b2)

    if (Mp, Np) != (M, N):
        out = out[:M, :N]
    return out


# ----------------------------- depthwise 3x3 conv + bias + GELU -----------------------------

def _dwconv_gelu_kernel(x_ref, top_ref, bot_ref, w_ref, b_ref, o_ref, *, TH, W):
    # x_ref  : (1, TH, W, C)  one H-strip of one batch element (NHWC, C in lanes)
    # top_ref: (1, 1, W, C)   row above the strip (clamped; masked to 0 at the image top)
    # bot_ref: (1, 1, W, C)   row below the strip (clamped; masked to 0 at the image bottom)
    # w_ref  : (3, 3, C)      depthwise weights
    # b_ref  : (1, C)         conv bias
    # o_ref  : (1, TH, W, C)  GELU(dwconv(x) + b), written exactly once
    f32 = jnp.float32
    h = pl.program_id(1)
    nh = pl.num_programs(1)

    # Strip with a 1-row halo; halo rows that fall outside the image behave like the conv's
    # implicit zero padding.
    top = top_ref[0].astype(f32) * (h > 0).astype(f32)
    bot = bot_ref[0].astype(f32) * (h < nh - 1).astype(f32)
    xs = jnp.concatenate([top, x_ref[0].astype(f32), bot], axis=0)   # (TH+2, W, C)

    # Reduce the kh (row) taps first: per output row, the summed contribution sourced from
    # input column w-1 / w / w+1 respectively.  All in values -> no RMW VMEM passes.
    def row_sum(kw):
        r = xs[0:TH] * w_ref[0, kw, :].astype(f32)
        r = r + xs[1:1 + TH] * w_ref[1, kw, :].astype(f32)
        r = r + xs[2:2 + TH] * w_ref[2, kw, :].astype(f32)
        return r                                                     # (TH, W, C)

    left, center, right = row_sum(0), row_sum(1), row_sum(2)

    # Column shifts with zero padding along W, applied once to the reduced slabs.
    # TODO(synk): replace with pltpu.roll(+-1, axis=1) + edge-column iota mask (XLU slot).
    zc = jnp.zeros((TH, 1, xs.shape[-1]), f32)
    acc = center
    acc = acc + jnp.concatenate([zc, left[:, :W - 1, :]], axis=1)    # from column w-1
    acc = acc + jnp.concatenate([right[:, 1:, :], zc], axis=1)       # from column w+1
    acc = acc + b_ref[...].astype(f32)

    # Exact (erf) GELU — matches torch.nn.GELU's default.
    out = 0.5 * acc * (1.0 + lax.erf(acc * (1.0 / math.sqrt(2.0))))
    o_ref[0] = out.astype(o_ref.dtype)


def dwconv3x3_gelu(x_nhwc, w_kkc, b, *, th=8, out_dtype=None):
    """x_nhwc: (B, H, W, C), w_kkc: (3, 3, C), b: (C,) -> GELU(depthwise 3x3 conv + bias)."""
    B, H, W, C = x_nhwc.shape
    out_dtype = out_dtype or x_nhwc.dtype

    TH = min(th, H)
    Hp = _round_up(H, TH)
    if Hp != H:
        # Appended zero rows behave exactly like the conv's zero padding, so rows < H stay exact;
        # the extra output rows are sliced off below.
        x_nhwc = jnp.pad(x_nhwc, ((0, 0), (0, Hp - H), (0, 0), (0, 0)))
    nh = Hp // TH

    b2 = b.reshape(1, C)
    kernel = functools.partial(_dwconv_gelu_kernel, TH=TH, W=W)

    out = pl.pallas_call(
        kernel,
        out_shape=jax.ShapeDtypeStruct((B, Hp, W, C), out_dtype),
        grid=(B, nh),
        in_specs=[
            pl.BlockSpec((1, TH, W, C), lambda bi, hi: (bi, hi, 0, 0)),
            # Halo rows: block size 1 along H -> block index == row index; clamp at the edges
            # (the kernel masks them to zero there).
            pl.BlockSpec((1, 1, W, C),
                         lambda bi, hi: (bi, jnp.maximum(hi * TH - 1, 0), 0, 0)),
            pl.BlockSpec((1, 1, W, C),
                         lambda bi, hi: (bi, jnp.minimum(hi * TH + TH, Hp - 1), 0, 0)),
            pl.BlockSpec((3, 3, C), lambda bi, hi: (0, 0, 0)),
            pl.BlockSpec((1, C), lambda bi, hi: (0, 0)),
        ],
        out_specs=pl.BlockSpec((1, TH, W, C), lambda bi, hi: (bi, hi, 0, 0)),
        compiler_params=pltpu.CompilerParams(
            dimension_semantics=("parallel", "parallel")),
        cost_estimate=pl.CostEstimate(
            flops=2 * 9 * B * Hp * W * C,
            transcendentals=B * Hp * W * C,
            bytes_accessed=2 * x_nhwc.dtype.itemsize * B * Hp * W * C),
    )(x_nhwc, x_nhwc, x_nhwc, w_kkc, b2)

    if Hp != H:
        out = out[:, :H]
    return out


# ----------------------------- module forward -----------------------------

def mlp_forward(x, H, W, params):
    """x: (B, N, C_in), N = H*W (row-major over H, W). Returns (B, N, C_out)."""
    B, N, C_in = x.shape
    assert N == H * W
    hidden = params["fc1_w"].shape[1]
    C_out = params["fc2_w"].shape[1]
    hidden_dtype = jnp.bfloat16   # hidden (B,H,W,4C) tensor travels in bf16 between kernels

    h = linear(x.reshape(B * N, C_in), params["fc1_w"], params["fc1_b"],
               out_dtype=hidden_dtype)                                         # fc1
    h = h.reshape(B, H, W, hidden)
    h = dwconv3x3_gelu(h, params["dw_w"], params["dw_b"], out_dtype=hidden_dtype)  # dwconv+GELU
    y = linear(h.reshape(B * N, hidden), params["fc2_w"], params["fc2_b"],
               out_dtype=x.dtype)                                              # fc2
    return y.reshape(B, N, C_out)


mlp_forward_jit = jax.jit(mlp_forward, static_argnums=(1, 2))


# ----------------------------- reference (plain JAX, f32) -----------------------------

def mlp_reference(x, H, W, params):
    B, N, C_in = x.shape
    hidden = params["fc1_w"].shape[1]
    h = x.reshape(B * N, C_in) @ params["fc1_w"] + params["fc1_b"]
    h = h.reshape(B, H, W, hidden)
    hp = jnp.pad(h, ((0, 0), (1, 1), (1, 1), (0, 0)))
    acc = jnp.zeros_like(h)
    for kh in range(3):
        for kw in range(3):
            acc = acc + hp[:, kh:kh + H, kw:kw + W, :] * params["dw_w"][kh, kw, :]
    acc = acc + params["dw_b"]
    acc = 0.5 * acc * (1.0 + jax.lax.erf(acc / jnp.sqrt(2.0)))
    y = acc.reshape(B * N, hidden) @ params["fc2_w"] + params["fc2_b"]
    return y.reshape(B, N, -1)


# ----------------------------- main -----------------------------

if __name__ == "__main__":
    B, H, W = 2, 8, 8
    N = H * W
    in_features = 16
    hidden_features = 32
    out_features = in_features

    key = jax.random.PRNGKey(0)
    k_x, k_fc1, k_dw, k_fc2 = jax.random.split(key, 4)

    # Deterministic synthetic weights mirroring the module's init scheme.
    fc1_w = (0.02 * jax.random.normal(k_fc1, (in_features, hidden_features))).astype(jnp.float32)
    fc1_b = jnp.zeros((hidden_features,), jnp.float32)
    fc2_w = (0.02 * jax.random.normal(k_fc2, (hidden_features, out_features))).astype(jnp.float32)
    fc2_b = jnp.zeros((out_features,), jnp.float32)
    dw_std = math.sqrt(2.0 / 9.0)   # fan_out = 3*3*dim/dim = 9
    dw_w = (dw_std * jax.random.normal(k_dw, (3, 3, hidden_features))).astype(jnp.float32)
    dw_b = jnp.zeros((hidden_features,), jnp.float32)

    params = dict(fc1_w=fc1_w, fc1_b=fc1_b, dw_w=dw_w, dw_b=dw_b,
                  fc2_w=fc2_w, fc2_b=fc2_b)

    x = jax.random.normal(k_x, (B, N, in_features), dtype=jnp.float32)

    y = mlp_forward_jit(x, H, W, params)
    y = jax.block_until_ready(y)

    y_ref = mlp_reference(x, H, W, params)
    assert y.shape == (B, N, out_features)

    diff = (y - y_ref).astype(jnp.float32)
    max_err = float(jnp.max(jnp.abs(diff)))
    rel_err = float(jnp.sqrt(jnp.sum(diff * diff)) /
                    (jnp.sqrt(jnp.sum(y_ref.astype(jnp.float32) ** 2)) + 1e-12))
    # bf16 operands / bf16 hidden intermediate intentionally change numerics vs the f32 reference.
    assert max_err < 5e-3 and rel_err < 3e-2, (max_err, rel_err)

    print("KERNEL_OK")
</pallas_src>

<mosaic_0001>
module attributes {stable_mosaic.version = 11 : i64} {
  func.func @_matmul_bias_1k_kernel(%arg0: i32, %arg1: i32, %arg2: memref<128x32xbf16, #tpu.memory_space<vmem>>, %arg3: memref<32x16xbf16, #tpu.memory_space<vmem>>, %arg4: memref<1x16xf32, #tpu.memory_space<vmem>>, %arg5: memref<128x16xf32, #tpu.memory_space<vmem>>) attributes {dimension_semantics = [#tpu.dimension_semantics<parallel>, #tpu.dimension_semantics<parallel>], iteration_bounds = array<i64: 1, 1>, scalar_prefetch = 0 : i64, scratch_operands = 0 : i64, tpu.core_type = #tpu.core_type<tc>, window_params = [{transform_indices = @transform_0, window_bounds = array<i64: 128, 32>}, {transform_indices = @transform_1, window_bounds = array<i64: 32, 16>}, {transform_indices = @transform_2, window_bounds = array<i64: 1, 16>}, {transform_indices = @transform_3, window_bounds = array<i64: 128, 16>}]} {
    %c0 = arith.constant 0 : index
    %c0_0 = arith.constant 0 : index
    %0 = vector.load %arg2[%c0, %c0_0] : memref<128x32xbf16, #tpu.memory_space<vmem>>, vector<128x32xbf16>
    %c0_1 = arith.constant 0 : index
    %c0_2 = arith.constant 0 : index
    %1 = vector.load %arg3[%c0_1, %c0_2] : memref<32x16xbf16, #tpu.memory_space<vmem>>, vector<32x16xbf16>
    %cst = arith.constant dense<0.000000e+00> : vector<128x16xf32>
    %2 = tpu.matmul %0, %1, %cst {dimension_numbers = #tpu.dot_dimension_numbers<[1], [0], [0], [1], [0, 0, 1, 1], [], []>} : vector<128x32xbf16>, vector<32x16xbf16>, vector<128x16xf32> -> vector<128x16xf32>
    %c0_3 = arith.constant 0 : index
    %c0_4 = arith.constant 0 : index
    %3 = vector.load %arg4[%c0_3, %c0_4] : memref<1x16xf32, #tpu.memory_space<vmem>>, vector<1x16xf32>
    %4 = vector.broadcast %3 : vector<1x16xf32> to vector<128x16xf32>
    %5 = arith.addf %2, %4 : vector<128x16xf32>
    %c0_5 = arith.constant 0 : index
    %c0_6 = arith.constant 0 : index
    %6 = vector.load %arg5[%c0_5, %c0_6] : memref<128x16xf32, #tpu.memory_space<vmem>>, vector<128x16xf32>
    tpu.vector_store %arg5[%c0_5, %c0_6], %5 {strides = array<i32>} : memref<128x16xf32, #tpu.memory_space<vmem>>, vector<128x16xf32>,
    return
  }
  func.func @transform_0(%arg0: i32, %arg1: i32) -> (i32, i32) {
    %c0_i32 = arith.constant 0 : i32
    %c0_i32_0 = arith.constant 0 : i32
    return %arg0, %c0_i32 : i32, i32
  }
  func.func @transform_1(%arg0: i32, %arg1: i32) -> (i32, i32) {
    %c0_i32 = arith.constant 0 : i32
    %c0_i32_0 = arith.constant 0 : i32
    return %c0_i32, %arg1 : i32, i32
  }
  func.func @transform_2(%arg0: i32, %arg1: i32) -> (i32, i32) {
    %c0_i32 = arith.constant 0 : i32
    %c0_i32_0 = arith.constant 0 : i32
    return %c0_i32, %arg1 : i32, i32
  }
  func.func @transform_3(%arg0: i32, %arg1: i32) -> (i32, i32) {
    %c0_i32 = arith.constant 0 : i32
    return %arg0, %arg1 : i32, i32
  }
}

module attributes {stable_mosaic.version = 11 : i64} {
  func.func @_matmul_bias_1k_kernel(%arg0: i32, %arg1: i32, %arg2: memref<128x16xbf16, #tpu.memory_space<vmem>>, %arg3: memref<16x32xbf16, #tpu.memory_space<vmem>>, %arg4: memref<1x32xf32, #tpu.memory_space<vmem>>, %arg5: memref<128x32xbf16, #tpu.memory_space<vmem>>) attributes {dimension_semantics = [#tpu.dimension_semantics<parallel>, #tpu.dimension_semantics<parallel>], iteration_bounds = array<i64: 1, 1>, scalar_prefetch = 0 : i64, scratch_operands = 0 : i64, tpu.core_type = #tpu.core_type<tc>, window_params = [{transform_indices = @transform_0, window_bounds = array<i64: 128, 16>}, {transform_indices = @transform_1, window_bounds = array<i64: 16, 32>}, {transform_indices = @transform_2, window_bounds = array<i64: 1, 32>}, {transform_indices = @transform_3, window_bounds = array<i64: 128, 32>}]} {
    %c0 = arith.constant 0 : index
    %c0_0 = arith.constant 0 : index
    %0 = vector.load %arg2[%c0, %c0_0] : memref<128x16xbf16, #tpu.memory_space<vmem>>, vector<128x16xbf16>
    %c0_1 = arith.constant 0 : index
    %c0_2 = arith.constant 0 : index
    %1 = vector.load %arg3[%c0_1, %c0_2] : memref<16x32xbf16, #tpu.memory_space<vmem>>, vector<16x32xbf16>
    %cst = arith.constant dense<0.000000e+00> : vector<128x32xf32>
    %2 = tpu.matmul %0, %1, %cst {dimension_numbers = #tpu.dot_dimension_numbers<[1], [0], [0], [1], [0, 0, 1, 1], [], []>} : vector<128x16xbf16>, vector<16x32xbf16>, vector<128x32xf32> -> vector<128x32xf32>
    %c0_3 = arith.constant 0 : index
    %c0_4 = arith.constant 0 : index
    %3 = vector.load %arg4[%c0_3, %c0_4] : memref<1x32xf32, #tpu.memory_space<vmem>>, vector<1x32xf32>
    %4 = vector.broadcast %3 : vector<1x32xf32> to vector<128x32xf32>
    %5 = arith.addf %2, %4 : vector<128x32xf32>
    %6 = arith.truncf %5 : vector<128x32xf32> to vector<128x32xbf16>
    %c0_5 = arith.constant 0 : index
    %c0_6 = arith.constant 0 : index
    %7 = vector.load %arg5[%c0_5, %c0_6] : memref<128x32xbf16, #tpu.memory_space<vmem>>, vector<128x32xbf16>
    tpu.vector_store %arg5[%c0_5, %c0_6], %6 {strides = array<i32>} : memref<128x32xbf16, #tpu.memory_space<vmem>>, vector<128x32xbf16>,
    return
  }
  func.func @transform_0(%arg0: i32, %arg1: i32) -> (i32, i32) {
    %c0_i32 = arith.constant 0 : i32
    %c0_i32_0 = arith.constant 0 : i32
    return %arg0, %c0_i32 : i32, i32
  }
  func.func @transform_1(%arg0: i32, %arg1: i32) -> (i32, i32) {
    %c0_i32 = arith.constant 0 : i32
    %c0_i32_0 = arith.constant 0 : i32
    return %c0_i32, %arg1 : i32, i32
  }
  func.func @transform_2(%arg0: i32, %arg1: i32) -> (i32, i32) {
    %c0_i32 = arith.constant 0 : i32
    %c0_i32_0 = arith.constant 0 : i32
    return %c0_i32, %arg1 : i32, i32
  }
  func.func @transform_3(%arg0: i32, %arg1: i32) -> (i32, i32) {
    %c0_i32 = arith.constant 0 : i32
    return %arg0, %arg1 : i32, i32
  }
}

module attributes {stable_mosaic.version = 11 : i64} {
  func.func @_dwconv_gelu_kernel(%arg0: i32, %arg1: i32, %arg2: memref<1x8x8x32xbf16, #tpu.memory_space<vmem>>, %arg3: memref<1x1x8x32xbf16, #tpu.memory_space<vmem>>, %arg4: memref<1x1x8x32xbf16, #tpu.memory_space<vmem>>, %arg5: memref<3x3x32xf32, #tpu.memory_space<vmem>>, %arg6: memref<1x32xf32, #tpu.memory_space<vmem>>, %arg7: memref<1x8x8x32xbf16, #tpu.memory_space<vmem>>) attributes {dimension_semantics = [#tpu.dimension_semantics<parallel>, #tpu.dimension_semantics<parallel>], iteration_bounds = array<i64: 2, 1>, scalar_prefetch = 0 : i64, scratch_operands = 0 : i64, tpu.core_type = #tpu.core_type<tc>, window_params = [{transform_indices = @transform_0, window_bounds = array<i64: 1, 8, 8, 32>}, {transform_indices = @transform_1, window_bounds = array<i64: 1, 1, 8, 32>}, {transform_indices = @transform_2, window_bounds = array<i64: 1, 1, 8, 32>}, {pipeline_mode = #tpu.pipeline_mode<synchronous>, transform_indices = @transform_3, window_bounds = array<i64: 3, 3, 32>}, {pipeline_mode = #tpu.pipeline_mode<synchronous>, transform_indices = @transform_4, window_bounds = array<i64: 1, 32>}, {transform_indices = @transform_5, window_bounds = array<i64: 1, 8, 8, 32>}]} {
    %c0 = arith.constant 0 : index
    %c0_0 = arith.constant 0 : index
    %c0_1 = arith.constant 0 : index
    %c0_2 = arith.constant 0 : index
    %0 = vector.load %arg3[%c0, %c0_0, %c0_1, %c0_2] : memref<1x1x8x32xbf16, #tpu.memory_space<vmem>>, vector<1x1x8x32xbf16>
    %1 = vector.shape_cast %0 : vector<1x1x8x32xbf16> to vector<1x8x32xbf16>
    %2 = arith.extf %1 : vector<1x8x32xbf16> to vector<1x8x32xf32>
    %c0_i32 = arith.constant 0 : i32
    %3 = arith.cmpi sgt, %arg1, %c0_i32 : i32
    %4 = arith.extui %3 : i1 to i32
    %5 = arith.sitofp %4 : i32 to f32
    %6 = vector.broadcast %5 : f32 to vector<1x8x32xf32>
    %7 = arith.mulf %2, %6 : vector<1x8x32xf32>
    %c0_3 = arith.constant 0 : index
    %c0_4 = arith.constant 0 : index
    %c0_5 = arith.constant 0 : index
    %c0_6 = arith.constant 0 : index
    %8 = vector.load %arg4[%c0_3, %c0_4, %c0_5, %c0_6] : memref<1x1x8x32xbf16, #tpu.memory_space<vmem>>, vector<1x1x8x32xbf16>
    %9 = vector.shape_cast %8 : vector<1x1x8x32xbf16> to vector<1x8x32xbf16>
    %10 = arith.extf %9 : vector<1x8x32xbf16> to vector<1x8x32xf32>
    %c0_i32_7 = arith.constant 0 : i32
    %11 = arith.cmpi slt, %arg1, %c0_i32_7 : i32
    %12 = arith.extui %11 : i1 to i32
    %13 = arith.sitofp %12 : i32 to f32
    %14 = vector.broadcast %13 : f32 to vector<1x8x32xf32>
    %15 = arith.mulf %10, %14 : vector<1x8x32xf32>
    %c0_8 = arith.constant 0 : index
    %c0_9 = arith.constant 0 : index
    %c0_10 = arith.constant 0 : index
    %c0_11 = arith.constant 0 : index
    %16 = vector.load %arg2[%c0_8, %c0_9, %c0_10, %c0_11] : memref<1x8x8x32xbf16, #tpu.memory_space<vmem>>, vector<1x8x8x32xbf16>
    %17 = vector.shape_cast %16 : vector<1x8x8x32xbf16> to vector<8x8x32xbf16>
    %18 = arith.extf %17 : vector<8x8x32xbf16> to vector<8x8x32xf32>
    %19 = tpu.concatenate %7, %18, %15 in 0 : vector<1x8x32xf32>, vector<8x8x32xf32>, vector<1x8x32xf32> -> vector<10x8x32xf32>
    %20 = vector.extract_strided_slice %19 {offsets = [0, 0, 0], sizes = [8, 8, 32], strides = [1, 1, 1]} : vector<10x8x32xf32> to vector<8x8x32xf32>
    %c0_12 = arith.constant 0 : index
    %c0_13 = arith.constant 0 : index
    %c0_14 = arith.constant 0 : index
    %21 = vector.load %arg5[%c0_12, %c0_13, %c0_14] : memref<3x3x32xf32, #tpu.memory_space<vmem>>, vector<1x1x32xf32>
    %22 = vector.shape_cast %21 : vector<1x1x32xf32> to vector<32xf32>
    %23 = vector.shape_cast %22 : vector<32xf32> to vector<1x1x32xf32>
    %24 = vector.broadcast %23 : vector<1x1x32xf32> to vector<8x8x32xf32>
    %25 = arith.mulf %20, %24 : vector<8x8x32xf32>
    %26 = vector.extract_strided_slice %19 {offsets = [1, 0, 0], sizes = [8, 8, 32], strides = [1, 1, 1]} : vector<10x8x32xf32> to vector<8x8x32xf32>
    %c1 = arith.constant 1 : index
    %c0_15 = arith.constant 0 : index
    %c0_16 = arith.constant 0 : index
    %27 = vector.load %arg5[%c1, %c0_15, %c0_16] : memref<3x3x32xf32, #tpu.memory_space<vmem>>, vector<1x1x32xf32>
    %28 = vector.shape_cast %27 : vector<1x1x32xf32> to vector<32xf32>
    %29 = vector.shape_cast %28 : vector<32xf32> to vector<1x1x32xf32>
    %30 = vector.broadcast %29 : vector<1x1x32xf32> to vector<8x8x32xf32>
    %31 = arith.mulf %26, %30 : vector<8x8x32xf32>
    %32 = arith.addf %25, %31 : vector<8x8x32xf32>
    %33 = vector.extract_strided_slice %19 {offsets = [2, 0, 0], sizes = [8, 8, 32], strides = [1, 1, 1]} : vector<10x8x32xf32> to vector<8x8x32xf32>
    %c2 = arith.constant 2 : index
    %c0_17 = arith.constant 0 : index
    %c0_18 = arith.constant 0 : index
    %34 = vector.load %arg5[%c2, %c0_17, %c0_18] : memref<3x3x32xf32, #tpu.memory_space<vmem>>, vector<1x1x32xf32>
    %35 = vector.shape_cast %34 : vector<1x1x32xf32> to vector<32xf32>
    %36 = vector.shape_cast %35 : vector<32xf32> to vector<1x1x32xf32>
    %37 = vector.broadcast %36 : vector<1x1x32xf32> to vector<8x8x32xf32>
    %38 = arith.mulf %33, %37 : vector<8x8x32xf32>
    %39 = arith.addf %32, %38 : vector<8x8x32xf32>
    %40 = vector.extract_strided_slice %19 {offsets = [0, 0, 0], sizes = [8, 8, 32], strides = [1, 1, 1]} : vector<10x8x32xf32> to vector<8x8x32xf32>
    %c0_19 = arith.constant 0 : index
    %c1_20 = arith.constant 1 : index
    %c0_21 = arith.constant 0 : index
    %41 = vector.load %arg5[%c0_19, %c1_20, %c0_21] : memref<3x3x32xf32, #tpu.memory_space<vmem>>, vector<1x1x32xf32>
    %42 = vector.shape_cast %41 : vector<1x1x32xf32> to vector<32xf32>
    %43 = vector.shape_cast %42 : vector<32xf32> to vector<1x1x32xf32>
    %44 = vector.broadcast %43 : vector<1x1x32xf32> to vector<8x8x32xf32>
    %45 = arith.mulf %40, %44 : vector<8x8x32xf32>
    %46 = vector.extract_strided_slice %19 {offsets = [1, 0, 0], sizes = [8, 8, 32], strides = [1, 1, 1]} : vector<10x8x32xf32> to vector<8x8x32xf32>
    %c1_22 = arith.constant 1 : index
    %c1_23 = arith.constant 1 : index
    %c0_24 = arith.constant 0 : index
    %47 = vector.load %arg5[%c1_22, %c1_23, %c0_24] : memref<3x3x32xf32, #tpu.memory_space<vmem>>, vector<1x1x32xf32>
    %48 = vector.shape_cast %47 : vector<1x1x32xf32> to vector<32xf32>
    %49 = vector.shape_cast %48 : vector<32xf32> to vector<1x1x32xf32>
    %50 = vector.broadcast %49 : vector<1x1x32xf32> to vector<8x8x32xf32>
    %51 = arith.mulf %46, %50 : vector<8x8x32xf32>
    %52 = arith.addf %45, %51 : vector<8x8x32xf32>
    %53 = vector.extract_strided_slice %19 {offsets = [2, 0, 0], sizes = [8, 8, 32], strides = [1, 1, 1]} : vector<10x8x32xf32> to vector<8x8x32xf32>
    %c2_25 = arith.constant 2 : index
    %c1_26 = arith.constant 1 : index
    %c0_27 = arith.constant 0 : index
    %54 = vector.load %arg5[%c2_25, %c1_26, %c0_27] : memref<3x3x32xf32, #tpu.memory_space<vmem>>, vector<1x1x32xf32>
    %55 = vector.shape_cast %54 : vector<1x1x32xf32> to vector<32xf32>
    %56 = vector.shape_cast %55 : vector<32xf32> to vector<1x1x32xf32>
    %57 = vector.broadcast %56 : vector<1x1x32xf32> to vector<8x8x32xf32>
    %58 = arith.mulf %53, %57 : vector<8x8x32xf32>
    %59 = arith.addf %52, %58 : vector<8x8x32xf32>
    %60 = vector.extract_strided_slice %19 {offsets = [0, 0, 0], sizes = [8, 8, 32], strides = [1, 1, 1]} : vector<10x8x32xf32> to vector<8x8x32xf32>
    %c0_28 = arith.constant 0 : index
    %c2_29 = arith.constant 2 : index
    %c0_30 = arith.constant 0 : index
    %61 = vector.load %arg5[%c0_28, %c2_29, %c0_30] : memref<3x3x32xf32, #tpu.memory_space<vmem>>, vector<1x1x32xf32>
    %62 = vector.shape_cast %61 : vector<1x1x32xf32> to vector<32xf32>
    %63 = vector.shape_cast %62 : vector<32xf32> to vector<1x1x32xf32>
    %64 = vector.broadcast %63 : vector<1x1x32xf32> to vector<8x8x32xf32>
    %65 = arith.mulf %60, %64 : vector<8x8x32xf32>
    %66 = vector.extract_strided_slice %19 {offsets = [1, 0, 0], sizes = [8, 8, 32], strides = [1, 1, 1]} : vector<10x8x32xf32> to vector<8x8x32xf32>
    %c1_31 = arith.constant 1 : index
    %c2_32 = arith.constant 2 : index
    %c0_33 = arith.constant 0 : index
    %67 = vector.load %arg5[%c1_31, %c2_32, %c0_33] : memref<3x3x32xf32, #tpu.memory_space<vmem>>, vector<1x1x32xf32>
    %68 = vector.shape_cast %67 : vector<1x1x32xf32> to vector<32xf32>
    %69 = vector.shape_cast %68 : vector<32xf32> to vector<1x1x32xf32>
    %70 = vector.broadcast %69 : vector<1x1x32xf32> to vector<8x8x32xf32>
    %71 = arith.mulf %66, %70 : vector<8x8x32xf32>
    %72 = arith.addf %65, %71 : vector<8x8x32xf32>
    %73 = vector.extract_strided_slice %19 {offsets = [2, 0, 0], sizes = [8, 8, 32], strides = [1, 1, 1]} : vector<10x8x32xf32> to vector<8x8x32xf32>
    %c2_34 = arith.constant 2 : index
    %c2_35 = arith.constant 2 : index
    %c0_36 = arith.constant 0 : index
    %74 = vector.load %arg5[%c2_34, %c2_35, %c0_36] : memref<3x3x32xf32, #tpu.memory_space<vmem>>, vector<1x1x32xf32>
    %75 = vector.shape_cast %74 : vector<1x1x32xf32> to vector<32xf32>
    %76 = vector.shape_cast %75 : vector<32xf32> to vector<1x1x32xf32>
    %77 = vector.broadcast %76 : vector<1x1x32xf32> to vector<8x8x32xf32>
    %78 = arith.mulf %73, %77 : vector<8x8x32xf32>
    %79 = arith.addf %72, %78 : vector<8x8x32xf32>
    %cst = arith.constant 0.000000e+00 : f32
    %80 = vector.broadcast %cst : f32 to vector<8x1x32xf32>
    %81 = vector.extract_strided_slice %39 {offsets = [0, 0, 0], sizes = [8, 7, 32], strides = [1, 1, 1]} : vector<8x8x32xf32> to vector<8x7x32xf32>
    %82 = tpu.concatenate %80, %81 in 1 : vector<8x1x32xf32>, vector<8x7x32xf32> -> vector<8x8x32xf32>
    %83 = arith.addf %59, %82 : vector<8x8x32xf32>
    %84 = vector.extract_strided_slice %79 {offsets = [0, 1, 0], sizes = [8, 7, 32], strides = [1, 1, 1]} : vector<8x8x32xf32> to vector<8x7x32xf32>
    %85 = tpu.concatenate %84, %80 in 1 : vector<8x7x32xf32>, vector<8x1x32xf32> -> vector<8x8x32xf32>
    %86 = arith.addf %83, %85 : vector<8x8x32xf32>
    %c0_37 = arith.constant 0 : index
    %c0_38 = arith.constant 0 : index
    %87 = vector.load %arg6[%c0_37, %c0_38] : memref<1x32xf32, #tpu.memory_space<vmem>>, vector<1x32xf32>
    %88 = vector.shape_cast %87 : vector<1x32xf32> to vector<1x1x32xf32>
    %89 = vector.broadcast %88 : vector<1x1x32xf32> to vector<8x8x32xf32>
    %90 = arith.addf %86, %89 : vector<8x8x32xf32>
    %cst_39 = arith.constant 5.000000e-01 : f32
    %91 = vector.broadcast %cst_39 : f32 to vector<8x8x32xf32>
    %92 = arith.mulf %91, %90 : vector<8x8x32xf32>
    %cst_40 = arith.constant 0.707106769 : f32
    %93 = vector.broadcast %cst_40 : f32 to vector<8x8x32xf32>
    %94 = arith.mulf %90, %93 : vector<8x8x32xf32>
    %95 = math.erf %94 : vector<8x8x32xf32>
    %cst_41 = arith.constant 1.000000e+00 : f32
    %96 = vector.broadcast %cst_41 : f32 to vector<8x8x32xf32>
    %97 = arith.addf %96, %95 : vector<8x8x32xf32>
    %98 = arith.mulf %92, %97 : vector<8x8x32xf32>
    %99 = arith.truncf %98 : vector<8x8x32xf32> to vector<8x8x32xbf16>
    %c0_42 = arith.constant 0 : index
    %c0_43 = arith.constant 0 : index
    %c0_44 = arith.constant 0 : index
    %c0_45 = arith.constant 0 : index
    %100 = vector.load %arg7[%c0_42, %c0_43, %c0_44, %c0_45] : memref<1x8x8x32xbf16, #tpu.memory_space<vmem>>, vector<1x8x8x32xbf16>
    %101 = vector.shape_cast %100 : vector<1x8x8x32xbf16> to vector<8x8x32xbf16>
    %102 = vector.shape_cast %99 : vector<8x8x32xbf16> to vector<1x8x8x32xbf16>
    tpu.vector_store %arg7[%c0_42, %c0_43, %c0_44, %c0_45], %102 {strides = array<i32>} : memref<1x8x8x32xbf16, #tpu.memory_space<vmem>>, vector<1x8x8x32xbf16>,
    return
  }
  func.func @transform_0(%arg0: i32, %arg1: i32) -> (i32, i32, i32, i32) {
    %c0_i32 = arith.constant 0 : i32
    %c0_i32_0 = arith.constant 0 : i32
    %c0_i32_1 = arith.constant 0 : i32
    return %arg0, %arg1, %c0_i32, %c0_i32_0 : i32, i32, i32, i32
  }
  func.func @transform_1(%arg0: i32, %arg1: i32) -> (i32, i32, i32, i32) {
    %c8_i32 = arith.constant 8 : i32
    %0 = arith.muli %arg1, %c8_i32 : i32
    %c1_i32 = arith.constant 1 : i32
    %1 = arith.subi %0, %c1_i32 : i32
    %c0_i32 = arith.constant 0 : i32
    %2 = arith.maxsi %1, %c0_i32 : i32
    %c0_i32_0 = arith.constant 0 : i32
    %c0_i32_1 = arith.constant 0 : i32
    %c0_i32_2 = arith.constant 0 : i32
    return %arg0, %2, %c0_i32_0, %c0_i32_1 : i32, i32, i32, i32
  }
  func.func @transform_2(%arg0: i32, %arg1: i32) -> (i32, i32, i32, i32) {
    %c8_i32 = arith.constant 8 : i32
    %0 = arith.muli %arg1, %c8_i32 : i32
    %c8_i32_0 = arith.constant 8 : i32
    %1 = arith.addi %0, %c8_i32_0 : i32
    %c7_i32 = arith.constant 7 : i32
    %2 = arith.minsi %1, %c7_i32 : i32
    %c0_i32 = arith.constant 0 : i32
    %c0_i32_1 = arith.constant 0 : i32
    %c0_i32_2 = arith.constant 0 : i32
    return %arg0, %2, %c0_i32, %c0_i32_1 : i32, i32, i32, i32
  }
  func.func @transform_3(%arg0: i32, %arg1: i32) -> (i32, i32, i32) {
    %c0_i32 = arith.constant 0 : i32
    %c0_i32_0 = arith.constant 0 : i32
    %c0_i32_1 = arith.constant 0 : i32
    %c0_i32_2 = arith.constant 0 : i32
    return %c0_i32, %c0_i32_0, %c0_i32_1 : i32, i32, i32
  }
  func.func @transform_4(%arg0: i32, %arg1: i32) -> (i32, i32) {
    %c0_i32 = arith.constant 0 : i32
    %c0_i32_0 = arith.constant 0 : i32
    %c0_i32_1 = arith.constant 0 : i32
    return %c0_i32, %c0_i32_0 : i32, i32
  }
  func.func @transform_5(%arg0: i32, %arg1: i32) -> (i32, i32, i32, i32) {
    %c0_i32 = arith.constant 0 : i32
    %c0_i32_0 = arith.constant 0 : i32
    %c0_i32_1 = arith.constant 0 : i32
    return %arg0, %arg1, %c0_i32, %c0_i32_0 : i32, i32, i32, i32
  }
}

</mosaic_0001>

<bundles_post_ra>
// kernel: mlp_forward.5
= control target key start
LH: loop header
LB: loop body
LE: loop exit
PB: predicated region body
PF: predicated region fallthrough
CT: control target
= control target key end

     0   :  { %vm94_vm0 = vcmask 261120   ;;  %vm216_vm1 = vcmask 130048   ;;  %s425_s1 = inlined_call_operand.vmem [shape: bf16[32,16], index: 1, kind: input, shape index: {}]   ;;  %s426_s0 = inlined_call_operand.vmem [shape: bf16[128,32], index: 0, kind: input, shape index: {}]   ;;  %s427_s2 = inlined_call_operand.vmem [shape: f32[1,16], index: 2, kind: input, shape index: {}]   ;;  %s428_s3 = inlined_call_operand.vmem [shape: f32[128,16], index: 3, kind: output, shape index: {}]  }
   0x1   :  { %v290_v0 = vld [vmem:[%s425_s1] sm:$0xff]   ;;  %v291_v1 = vld [vmem:[%s425_s1 + $0x8] sm:$0xff]   ;;  %v296_v6 = vld [vmem:[%s426_s0 + $0x10] sm:$0xff]  }
   0x2   :  { %266 = vmatprep.subr.bf16.mxu0 %v290_v0  ;;  %286 = vmatprep.subr.bf16.mxu1 %v290_v0  ;;  %v292_v2 = vld [vmem:[%s426_s0] sm:$0xff]   ;;  %v294_v4 = vld [vmem:[%s426_s0 + $0x8] sm:$0xff]   ;;  %v297_v7 = vld [vmem:[%s426_s0 + $0x30] sm:$0xff]  }
   0x3   :  { %267 = vmatpush3.bf16.msra.mxu0 %v290_v0  ;;  %288 = vmatpush3.bf16.msra.mxu1 %v290_v0  ;;  %v293_v3 = vld [vmem:[%s426_s0 + $0x20] sm:$0xff]   ;;  %v295_v5 = vld [vmem:[%s426_s0 + $0x28] sm:$0xff]   ;;  %v298_v8 = vld [vmem:[%s426_s0 + $0x18] sm:$0xff]  }
   0x4   :  { %268 = vmatprep.subr.bf16.mxu0 %v291_v1  ;;  %287 = vmatprep.subr.bf16.mxu1 %v291_v1  ;;  %v299_v9 = vld [vmem:[%s426_s0 + $0x38] sm:$0xff]   ;;  %v237_v10 = vld [vmem:[%s427_s2] ss:$0 sm:$0xff] }
   0x5   :  { %270 = vmatprep.mubr.msk.bf16.mxu0 %vm94_vm0, %v292_v2  ;;  %278 = vmatprep.mubr.msk.bf16.mxu1 %vm94_vm0, %v293_v3 }
   0x7   :  { %269 = vmatpush3.bf16.msra.mxu0 %v291_v1  ;;  %289 = vmatpush3.bf16.msra.mxu1 %v291_v1 }
   0xa   :  { %271 = vmatmul.mubr.msk.bf16.vlgmr.msra.gmra.mrb[0].mxu0 %vm94_vm0, %v294_v4  ;;  %279 = vmatmul.mubr.msk.bf16.vlgmr.msra.gmra.mrb[0].mxu1 %vm94_vm0, %v295_v5 }
   0xb   :  { %274 = vmatprep.mubr.msk.bf16.mxu0 %vm94_vm0, %v296_v6  ;;  %282 = vmatprep.mubr.msk.bf16.mxu1 %vm94_vm0, %v297_v7 }
  0x12   :  { %275 = vmatmul.mubr.msk.bf16.gmra.mrb[4].mxu0 %vm94_vm0, %v298_v8  ;;  %283 = vmatmul.mubr.msk.bf16.gmra.mrb[4].mxu1 %vm94_vm0, %v299_v9 }
  0xdd   :  { %v272_v11 = vpop.f32.mrb[0].mxu0  ;;  %v280_v12 = vpop.f32.mrb[0].mxu1 }
  0xde   :  { %v162_v13 = vadd.f32 %v272_v11, %v237_v10  ;;  %v194_v14 = vadd.f32 %v280_v12, %v237_v10  ;;  %v153_v15 = vpop.f32.mrb[1].mxu0  ;;  %v185_v16 = vpop.f32.mrb[1].mxu1 }
  0xdf   :  { %v154_v17 = vadd.f32 %v237_v10, %v153_v15  ;;  %v186_v18 = vadd.f32 %v237_v10, %v185_v16  ;;  %v273_v19 = vpop.f32.mrb[2].mxu0  ;;  %v281_v20 = vpop.f32.mrb[2].mxu1 }
  0xe0   :  { %219 = vst.msk [vmem:[%s428_s3 + $0x10] sm:$0xff] %vm216_vm1, %v162_v13  ;;  %227 = vst.msk [vmem:[%s428_s3 + $0x50] sm:$0xff] %vm216_vm1, %v194_v14  ;;  %v165_v21 = vadd.f32 %v273_v19, %v237_v10  ;;  %v197_v22 = vadd.f32 %v281_v20, %v237_v10  ;;  %v156_v23 = vpop.f32.mrb[3].mxu0  ;;  %v188_v24 = vpop.f32.mrb[3].mxu1 }
  0xe1   :  { %217 = vst.msk [vmem:[%s428_s3] sm:$0xff] %vm216_vm1, %v154_v17  ;;  %225 = vst.msk [vmem:[%s428_s3 + $0x40] sm:$0xff] %vm216_vm1, %v186_v18  ;;  %v157_v25 = vadd.f32 %v237_v10, %v156_v23  ;;  %v189_v26 = vadd.f32 %v237_v10, %v188_v24 }
  0xe2   :  { %220 = vst.msk [vmem:[%s428_s3 + $0x18] sm:$0xff] %vm216_vm1, %v165_v21  ;;  %228 = vst.msk [vmem:[%s428_s3 + $0x58] sm:$0xff] %vm216_vm1, %v197_v22 }
  0xe3   :  { %218 = vst.msk [vmem:[%s428_s3 + $0x8] sm:$0xff] %vm216_vm1, %v157_v25  ;;  %226 = vst.msk [vmem:[%s428_s3 + $0x48] sm:$0xff] %vm216_vm1, %v189_v26 }
  0xe5   :  { %v276_v27 = vpop.f32.mrb[4].mxu0  ;;  %v284_v28 = vpop.f32.mrb[4].mxu1 }
  0xe6   :  { %v178_v29 = vadd.f32 %v276_v27, %v237_v10  ;;  %v210_v30 = vadd.f32 %v284_v28, %v237_v10  ;;  %v169_v31 = vpop.f32.mrb[5].mxu0  ;;  %v201_v32 = vpop.f32.mrb[5].mxu1 }
  0xe7   :  { %v170_v33 = vadd.f32 %v237_v10, %v169_v31  ;;  %v202_v34 = vadd.f32 %v237_v10, %v201_v32  ;;  %v277_v35 = vpop.f32.mrb[6].mxu0  ;;  %v285_v36 = vpop.f32.mrb[6].mxu1 }
  0xe8   :  { %223 = vst.msk [vmem:[%s428_s3 + $0x30] sm:$0xff] %vm216_vm1, %v178_v29  ;;  %231 = vst.msk [vmem:[%s428_s3 + $0x70] sm:$0xff] %vm216_vm1, %v210_v30  ;;  %v181_v37 = vadd.f32 %v277_v35, %v237_v10  ;;  %v213_v38 = vadd.f32 %v285_v36, %v237_v10  ;;  %v172_v39 = vpop.f32.mrb[7].mxu0  ;;  %v204_v40 = vpop.f32.mrb[7].mxu1 }
  0xe9   :  { %221 = vst.msk [vmem:[%s428_s3 + $0x20] sm:$0xff] %vm216_vm1, %v170_v33  ;;  %229 = vst.msk [vmem:[%s428_s3 + $0x60] sm:$0xff] %vm216_vm1, %v202_v34  ;;  %v173_v41 = vadd.f32 %v237_v10, %v172_v39  ;;  %v205_v42 = vadd.f32 %v237_v10, %v204_v40 }
  0xea   :  { %224 = vst.msk [vmem:[%s428_s3 + $0x38] sm:$0xff] %vm216_vm1, %v181_v37  ;;  %232 = vst.msk [vmem:[%s428_s3 + $0x78] sm:$0xff] %vm216_vm1, %v213_v38 }
  0xeb   :  { %222 = vst.msk [vmem:[%s428_s3 + $0x28] sm:$0xff] %vm216_vm1, %v173_v41  ;;  %230 = vst.msk [vmem:[%s428_s3 + $0x68] sm:$0xff] %vm216_vm1, %v205_v42 }

// kernel: mlp_forward.3
= control target key start
LH: loop header
LB: loop body
LE: loop exit
PB: predicated region body
PF: predicated region fallthrough
CT: control target
= control target key end

     0   :  { %vm86_vm0 = vcmask 130048   ;;  %vm272_vm1 = vcmask 257024   ;;  %s503_s1 = inlined_call_operand.vmem [shape: bf16[16,32], index: 1, kind: input, shape index: {}]   ;;  %s504_s0 = inlined_call_operand.vmem [shape: bf16[128,16], index: 0, kind: input, shape index: {}]   ;;  %s505_s2 = inlined_call_operand.vmem [shape: f32[1,32], index: 2, kind: input, shape index: {}]   ;;  %s506_s3 = inlined_call_operand.vmem [shape: bf16[128,32], index: 3, kind: output, shape index: {}]  }
   0x1   :  { %v372_v0 = vld [vmem:[%s503_s1] sm:$0xff]   ;;  %v375_v3 = vld [vmem:[%s504_s0 + $0x8] sm:$0xff]   ;;  %v377_v5 = vld [vmem:[%s504_s0 + $0x10] sm:$0xff]  }
   0x2   :  { %v373_v1 = vld [vmem:[%s504_s0] sm:$0xff]   ;;  %352 = vmatprep.subr.bf16.mxu0 %v372_v0  ;;  %370 = vmatprep.subr.bf16.mxu1 %v372_v0  ;;  %v376_v4 = vld [vmem:[%s504_s0 + $0x28] sm:$0xff]   ;;  %v378_v6 = vld [vmem:[%s504_s0 + $0x30] sm:$0xff]  }
   0x3   :  { %v374_v2 = vld [vmem:[%s504_s0 + $0x20] sm:$0xff]   ;;  %353 = vmatpush3.bf16.msra.mxu0 %v372_v0  ;;  %371 = vmatpush3.bf16.msra.mxu1 %v372_v0  ;;  %v379_v7 = vld [vmem:[%s504_s0 + $0x18] sm:$0xff]  }
   0x4   :  { %354 = vmatprep.mubr.msk.bf16.mxu0 %vm86_vm0, %v373_v1  ;;  %362 = vmatprep.mubr.msk.bf16.mxu1 %vm86_vm0, %v374_v2  ;;  %v380_v8 = vld [vmem:[%s504_s0 + $0x38] sm:$0xff]   ;;  %v293_v9 = vld [vmem:[%s505_s2] ss:$0 sm:$0xff] }
   0x6   :  { %355 = vmatmul.mubr.msk.bf16.vlgmr.msra.gmra.mrb[0].mxu0 %vm86_vm0, %v375_v3  ;;  %363 = vmatmul.mubr.msk.bf16.vlgmr.msra.gmra.mrb[0].mxu1 %vm86_vm0, %v376_v4 }
   0x7   :  { %358 = vmatprep.mubr.msk.bf16.mxu0 %vm86_vm0, %v377_v5  ;;  %366 = vmatprep.mubr.msk.bf16.mxu1 %vm86_vm0, %v378_v6 }
   0xe   :  { %359 = vmatmul.mubr.msk.bf16.gmra.mrb[4].mxu0 %vm86_vm0, %v379_v7  ;;  %367 = vmatmul.mubr.msk.bf16.gmra.mrb[4].mxu1 %vm86_vm0, %v380_v8 }
  0xd9   :  { %v356_v10 = vpop.f32.mrb[0].mxu0  ;;  %v364_v11 = vpop.f32.mrb[0].mxu1 }
  0xda   :  { %v154_v12 = vadd.f32 %v356_v10, %v293_v9  ;;  %v186_v13 = vadd.f32 %v364_v11, %v293_v9  ;;  %v145_v14 = vpop.f32.mrb[1].mxu0  ;;  %v177_v15 = vpop.f32.mrb[1].mxu1 }
  0xdb   :  { %v146_v16 = vadd.f32 %v293_v9, %v145_v14  ;;  %v178_v17 = vadd.f32 %v293_v9, %v177_v15  ;;  %v357_v18 = vpop.f32.mrb[2].mxu0  ;;  %v365_v19 = vpop.f32.mrb[2].mxu1 }
  0xdc   :  { %v329_v20 = vpack.c.bf16 %v154_v12, %v154_v12  ;;  %v337_v21 = vpack.c.bf16 %v186_v13, %v186_v13  ;;  %v157_v22 = vadd.f32 %v357_v18, %v293_v9  ;;  %v189_v23 = vadd.f32 %v365_v19, %v293_v9  ;;  %v148_v24 = vpop.f32.mrb[3].mxu0  ;;  %v180_v25 = vpop.f32.mrb[3].mxu1 }
  0xdd   :  { %v327_v26 = vpack.c.bf16 %v146_v16, %v146_v16  ;;  %v335_v27 = vpack.c.bf16 %v178_v17, %v178_v17  ;;  %v149_v28 = vadd.f32 %v293_v9, %v148_v24  ;;  %v181_v29 = vadd.f32 %v293_v9, %v180_v25 }
  0xde   :  { %275 = vst.msk [vmem:[%s506_s3 + $0x8] sm:$0xf] %vm272_vm1, %v329_v20  ;;  %283 = vst.msk [vmem:[%s506_s3 + $0x28] sm:$0xf] %vm272_vm1, %v337_v21  ;;  %v330_v30 = vpack.c.bf16 %v157_v22, %v157_v22  ;;  %v338_v31 = vpack.c.bf16 %v189_v23, %v189_v23 }
  0xdf   :  { %273 = vst.msk [vmem:[%s506_s3] sm:$0xf] %vm272_vm1, %v327_v26  ;;  %281 = vst.msk [vmem:[%s506_s3 + $0x20] sm:$0xf] %vm272_vm1, %v335_v27  ;;  %v328_v32 = vpack.c.bf16 %v149_v28, %v149_v28  ;;  %v336_v33 = vpack.c.bf16 %v181_v29, %v181_v29 }
  0xe0   :  { %276 = vst.msk [vmem:[%s506_s3 + $0xc] sm:$0xf] %vm272_vm1, %v330_v30  ;;  %284 = vst.msk [vmem:[%s506_s3 + $0x2c] sm:$0xf] %vm272_vm1, %v338_v31 }
  0xe1   :  { %274 = vst.msk [vmem:[%s506_s3 + $0x4] sm:$0xf] %vm272_vm1, %v328_v32  ;;  %282 = vst.msk [vmem:[%s506_s3 + $0x24] sm:$0xf] %vm272_vm1, %v336_v33  ;;  %v360_v34 = vpop.f32.mrb[4].mxu0  ;;  %v368_v35 = vpop.f32.mrb[4].mxu1 }
  0xe2   :  { %v170_v36 = vadd.f32 %v360_v34, %v293_v9  ;;  %v202_v37 = vadd.f32 %v368_v35, %v293_v9  ;;  %v161_v38 = vpop.f32.mrb[5].mxu0  ;;  %v193_v39 = vpop.f32.mrb[5].mxu1 }
  0xe3   :  { %v162_v40 = vadd.f32 %v293_v9, %v161_v38  ;;  %v194_v41 = vadd.f32 %v293_v9, %v193_v39  ;;  %v361_v42 = vpop.f32.mrb[6].mxu0  ;;  %v369_v43 = vpop.f32.mrb[6].mxu1 }
  0xe4   :  { %v333_v44 = vpack.c.bf16 %v170_v36, %v170_v36  ;;  %v341_v45 = vpack.c.bf16 %v202_v37, %v202_v37  ;;  %v173_v46 = vadd.f32 %v361_v42, %v293_v9  ;;  %v205_v47 = vadd.f32 %v369_v43, %v293_v9  ;;  %v164_v48 = vpop.f32.mrb[7].mxu0  ;;  %v196_v49 = vpop.f32.mrb[7].mxu1 }
  0xe5   :  { %v331_v50 = vpack.c.bf16 %v162_v40, %v162_v40  ;;  %v339_v51 = vpack.c.bf16 %v194_v41, %v194_v41  ;;  %v165_v52 = vadd.f32 %v293_v9, %v164_v48  ;;  %v197_v53 = vadd.f32 %v293_v9, %v196_v49 }
  0xe6   :  { %279 = vst.msk [vmem:[%s506_s3 + $0x18] sm:$0xf] %vm272_vm1, %v333_v44  ;;  %287 = vst.msk [vmem:[%s506_s3 + $0x38] sm:$0xf] %vm272_vm1, %v341_v45  ;;  %v334_v54 = vpack.c.bf16 %v173_v46, %v173_v46  ;;  %v342_v55 = vpack.c.bf16 %v205_v47, %v205_v47 }
  0xe7   :  { %277 = vst.msk [vmem:[%s506_s3 + $0x10] sm:$0xf] %vm272_vm1, %v331_v50  ;;  %285 = vst.msk [vmem:[%s506_s3 + $0x30] sm:$0xf] %vm272_vm1, %v339_v51  ;;  %v332_v56 = vpack.c.bf16 %v165_v52, %v165_v52  ;;  %v340_v57 = vpack.c.bf16 %v197_v53, %v197_v53 }
  0xe8   :  { %280 = vst.msk [vmem:[%s506_s3 + $0x1c] sm:$0xf] %vm272_vm1, %v334_v54  ;;  %288 = vst.msk [vmem:[%s506_s3 + $0x3c] sm:$0xf] %vm272_vm1, %v342_v55 }
  0xe9   :  { %278 = vst.msk [vmem:[%s506_s3 + $0x14] sm:$0xf] %vm272_vm1, %v332_v56  ;;  %286 = vst.msk [vmem:[%s506_s3 + $0x34] sm:$0xf] %vm272_vm1, %v340_v57 }

// kernel: mlp_forward.4
= control target key start
LH: loop header
LB: loop body
LE: loop exit
PB: predicated region body
PF: predicated region fallthrough
CT: control target
= control target key end

     0   :  { %s1006_s18 = smov 0   ;;  %s1008_s19 = smov 0   ;;  %s1293_s0 = inlined_call_operand.vmem [shape: bf16[2,8,8,32], index: 0, kind: input, shape index: {}, may-alias: {0,1,2}]   ;;  %s1294_s1 = inlined_call_operand.vmem [shape: bf16[2,8,8,32], index: 1, kind: input, shape index: {}, may-alias: {0,1,2}]   ;;  %s1295_s2 = inlined_call_operand.vmem [shape: bf16[2,8,8,32], index: 2, kind: input, shape index: {}, may-alias: {0,1,2}]   ;;  %s1296_s3 = inlined_call_operand.vmem [shape: f32[3,3,32], index: 3, kind: input, shape index: {}]   ;;  %s1297_s4 = inlined_call_operand.vmem [shape: f32[1,32], index: 4, kind: input, shape index: {}]   ;;  %s1298_s5 = inlined_call_operand.vmem [shape: bf16[2,8,8,32], index: 5, kind: output, shape index: {}]  }
   0x1   :  { %s1010_s20 = smov 0  }
   0x2 LB: > { %s27_s21 = sadd.s32 1, %s970_s19  ;;  %p860_p0 = scmp.ge.s32.totalorder %s974_s20, 1  ;;  %s974_s20 = sphi %s1010_s20, %s15_s20   ;;  %s970_s19 = sphi %s1008_s19, %s1300_s19   ;;  %s966_s18 = sphi %s1006_s18, %s1299_s18  }
   0x3   : > { %p29_p1 = scmp.ge.s32.totalorder %s27_s21, 2  ;;  %p270_p2 = scmp.lt.s32.totalorder %s974_s20, 3 }
   0x5   : > { %s1302_s21 = smov (%p29_p1, %s27_s21), 0  ;;  %p271_p3 = pnand %p860_p0, %p270_p2 }
   0x6   : > { %p331_p4 = scmp.lt.s32.totalorder (!%p271_p3), %s966_s18, 1  ;;  %v1029_v0 = vld [vmem:[%s1296_s3 + $0x4] ss:$0 sm:$0xff] (!%p271_p3)  ;;  %v1034_v1 = vld [vmem:[%s1296_s3 + $0x8] ss:$0 sm:$0xff] (!%p271_p3)  ;;  %vm603_vm0 = vcmask (!%p271_p3), 1040384  }
   0x7   : > { %274 = sbr.rel (%p271_p3) target bundleno = 100 (0x64), region = 40  ;;  %v1047_v2 = vld [vmem:[%s1296_s3 + $0x5] ss:$0 sm:$0xff] (!%p271_p3)  ;;  %v1052_v3 = vld [vmem:[%s1296_s3 + $0x9] ss:$0 sm:$0xff] (!%p271_p3)  ;;  %vm644_vm1 = vcmask (!%p271_p3), 1046528  }
   0x8   : > { %v1057_v4 = vld [vmem:[%s1296_s3 + $0x6] ss:$0 sm:$0xff] (!%p271_p3)  ;;  %v1066_v13 = vld [vmem:[%s1296_s3 + $0xa] ss:$0 sm:$0xff] (!%p271_p3)  ;;  %v1079_v18 = vld [vmem:[%s1296_s3] ss:$0 sm:$0xff] (!%p271_p3) }
   0x9   : > { %v1084_v19 = vld [vmem:[%s1296_s3 + $0x1] ss:$0 sm:$0xff] (!%p271_p3)  ;;  %v1089_v20 = vld [vmem:[%s1296_s3 + $0x2] ss:$0 sm:$0xff] (!%p271_p3)  ;;  %vm724_vm2 = vcmask (!%p271_p3), 257024  }
   0xe   : > { %s1304_s18 = smov (!%p331_p4, %s966_s18), 1 }
   0xf   : > { %s1024_s22 = sshll.u32 %s1304_s18, 5 }
  0x10   : > { %s338_s29 = scalar_lea.vmem %s1293_s0, %s1024_s22  ;;  %s351_s7 = scalar_lea.vmem %s1294_s1, %s1024_s22 }
  0x11   : > { %v382_v5 = vld [vmem:[%s351_s7] sm:$0xf]  ;;  %v909_v7 = vld [vmem:[%s338_s29 + $0x8] sm:$0xff]   ;;  %v910_v11 = vld [vmem:[%s338_s29 + $0x10] sm:$0xff]   ;;  %s1216_s30 = scalar_lea.vmem %s1298_s5, %s1024_s22  ;;  %s890_s6 = sadd.s32 28, %s1024_s22 }
  0x12   : > { %v893_v6 = vld [vmem:[%s338_s29] sm:$0xff]   ;;  %v383_v8 = vunpack.c.l.bf16 %v382_v5  ;;  %v1061_v12 = vld [vmem:[%s338_s29 + $0x18] sm:$0xff]   ;;  %v1068_v14 = vunpack.c.l.bf16 %v909_v7  ;;  %v1070_v15 = vunpack.c.h.bf16 %v909_v7  ;;  %v1072_v16 = vunpack.c.l.bf16 %v910_v11  ;;  %s367_s8 = scalar_lea.vmem %s1295_s2, %s890_s6 }
  0x13   : > { %v894_v9 = vunpack.c.l.bf16 %v893_v6  ;;  %v1059_v10 = vunpack.c.h.bf16 %v893_v6  ;;  %v1074_v17 = vunpack.c.h.bf16 %v910_v11  ;;  %v1092_v22 = vunpack.c.l.bf16 %v1061_v12  ;;  %v1139_v11 = vld [vmem:[%s1297_s4] ss:$0 sm:$0xff] }
  0x14   : > { %v388_v21 = vmul.f32 0.0, %v383_v8  ;;  %v454_v34 = vmul.f32 %v1068_v14, %v1034_v1  ;;  %v509_v40 = vmul.f32 %v1068_v14, %v1052_v3  ;;  %v564_v48 = vmul.f32 %v1068_v14, %v1066_v13 }
  0x15   : > { %v431_v23 = vmul.f32 %v894_v9, %v1029_v0  ;;  %v453_v24 = vmul.f32 %v1059_v10, %v1034_v1  ;;  %v487_v25 = vmul.f32 %v894_v9, %v1047_v2  ;;  %v508_v26 = vmul.f32 %v1059_v10, %v1052_v3 }
  0x16   : > { %v542_v27 = vmul.f32 %v894_v9, %v1057_v4  ;;  %v563_v28 = vmul.f32 %v1059_v10, %v1066_v13  ;;  %v417_v29 = vmul.f32 %v1079_v18, %v388_v21  ;;  %v474_v30 = vmul.f32 %v1084_v19, %v388_v21 }
  0x17   : > { %v529_v31 = vmul.f32 %v1089_v20, %v388_v21  ;;  %v418_v32 = vmul.f32 %v894_v9, %v1079_v18  ;;  %v432_v33 = vmul.f32 %v1059_v10, %v1029_v0  ;;  %v475_v35 = vmul.f32 %v894_v9, %v1084_v19 }
  0x18   : > { %v488_v36 = vmul.f32 %v1059_v10, %v1047_v2  ;;  %v439_v37 = vadd.f32 %v431_v23, %v417_v29  ;;  %v495_v38 = vadd.f32 %v487_v25, %v474_v30  ;;  %v530_v43 = vmul.f32 %v894_v9, %v1089_v20 }
  0x19   : > { %v550_v39 = vadd.f32 %v542_v27, %v529_v31  ;;  %v440_v41 = vadd.f32 %v432_v33, %v418_v32  ;;  %v543_v44 = vmul.f32 %v1059_v10, %v1057_v4  ;;  %v419_v52 = vmul.f32 %v1059_v10, %v1079_v18 }
  0x1a   : > { %v496_v42 = vadd.f32 %v488_v36, %v475_v35  ;;  %v461_v45 = vadd.f32 %v453_v24, %v439_v37  ;;  %v516_v46 = vadd.f32 %v508_v26, %v495_v38  ;;  %v433_v55 = vmul.f32 %v1068_v14, %v1029_v0 }
  0x1b   : > { %v571_v47 = vadd.f32 %v563_v28, %v550_v39  ;;  %v462_v49 = vadd.f32 %v454_v34, %v440_v41  ;;  %v551_v51 = vadd.f32 %v543_v44, %v530_v43  ;;  %v455_v56 = vmul.f32 %v1070_v15, %v1034_v1 }
  0x1c   : > { %v517_v50 = vadd.f32 %v509_v40, %v496_v42  ;;  %v587_v53 = vrot.slane %v461_v45, 7  ;;  %v476_v59 = vmul.f32 %v1059_v10, %v1084_v19  ;;  %v489_v60 = vmul.f32 %v1068_v14, %v1047_v2 }
  0x1d   : > { %v628_v54 = vrot.slane %v571_v47, 1  ;;  %v572_v57 = vadd.f32 %v564_v48, %v551_v51  ;;  %v588_v58 = vrot.slane %v462_v49, 7  ;;  %v441_v63 = vadd.f32 %v433_v55, %v419_v52 }
  0x1e   : > { %v604_v61 = vsel %vm603_vm0, 0.0, %v587_v53  ;;  %v510_v5 = vmul.f32 %v1070_v15, %v1052_v3  ;;  %v497_v9 = vadd.f32 %v489_v60, %v476_v59  ;;  %v531_v24 = vmul.f32 %v1059_v10, %v1089_v20 }
  0x1f   : > { %v645_v62 = vsel %vm644_vm1, %v628_v54, 0.0  ;;  %v612_v6 = vadd.f32 %v604_v61, %v516_v46  ;;  %v605_v7 = vsel %vm603_vm0, 0.0, %v588_v58  ;;  %v629_v8 = vrot.slane %v572_v57, 1 }
  0x20   : > { %v613_v21 = vadd.f32 %v605_v7, %v517_v50  ;;  %v463_v23 = vadd.f32 %v455_v56, %v441_v63  ;;  %v544_v25 = vmul.f32 %v1068_v14, %v1057_v4  ;;  %v518_v28 = vadd.f32 %v510_v5, %v497_v9 }
  0x21   : > { %v653_v26 = vadd.f32 %v645_v62, %v612_v6  ;;  %v646_v27 = vsel %vm644_vm1, %v629_v8, 0.0  ;;  %v565_v29 = vmul.f32 %v1070_v15, %v1066_v13  ;;  %v420_v33 = vmul.f32 %v1068_v14, %v1079_v18 }
  0x22   : > { %v654_v30 = vadd.f32 %v646_v27, %v613_v21  ;;  %v552_v31 = vadd.f32 %v544_v25, %v531_v24  ;;  %v589_v32 = vrot.slane %v463_v23, 7  ;;  %v434_v10 = vmul.f32 %v1070_v15, %v1029_v0 }
  0x23   : > { %v668_v34 = vadd.f32 %v1139_v11, %v653_v26  ;;  %v456_v35 = vmul.f32 %v1072_v16, %v1034_v1  ;;  %v477_v36 = vmul.f32 %v1068_v14, %v1084_v19  ;;  %v490_v40 = vmul.f32 %v1070_v15, %v1047_v2 }
  0x24   : > { %v669_v37 = vadd.f32 %v1139_v11, %v654_v30  ;;  %v573_v38 = vadd.f32 %v565_v29, %v552_v31  ;;  %v606_v39 = vsel %vm603_vm0, 0.0, %v589_v32  ;;  %v1162_v41 = vunpack.c.h.bf16 %v1061_v12 }
  0x25   : > { %v684_v42 = vmul.f32 0.70710677, %v668_v34  ;;  %v614_v43 = vadd.f32 %v606_v39, %v518_v28  ;;  %v442_v44 = vadd.f32 %v434_v10, %v420_v33  ;;  %v676_v45 = vmul.f32 0.5, %v668_v34 }
  0x26   : > { %v685_v46 = vmul.f32 0.70710677, %v669_v37  ;;  %v630_v47 = vrot.slane %v573_v38, 1  ;;  %v498_v48 = vadd.f32 %v490_v40, %v477_v36  ;;  %v511_v50 = vmul.f32 %v1072_v16, %v1052_v3 }
  0x27   : > { %936 = verf.f32 %v684_v42  ;;  %v464_v49 = vadd.f32 %v456_v35, %v442_v44  ;;  %v532_v51 = vmul.f32 %v1068_v14, %v1089_v20  ;;  %v545_v12 = vmul.f32 %v1070_v15, %v1057_v4 }
  0x28   : > { %938 = verf.f32 %v685_v46  ;;  %v647_v52 = vsel %vm644_vm1, %v630_v47, 0.0  ;;  %v566_v53 = vmul.f32 %v1072_v16, %v1066_v13  ;;  %v519_v55 = vadd.f32 %v511_v50, %v498_v48 }
  0x29   : > { %v655_v54 = vadd.f32 %v647_v52, %v614_v43  ;;  %v590_v56 = vrot.slane %v464_v49, 7  ;;  %v421_v57 = vmul.f32 %v1070_v15, %v1079_v18  ;;  %v553_v58 = vadd.f32 %v545_v12, %v532_v51 }
  0x2a   : > { %v435_v59 = vmul.f32 %v1072_v16, %v1029_v0  ;;  %v457_v14 = vmul.f32 %v1074_v17, %v1034_v1  ;;  %v478_v60 = vmul.f32 %v1070_v15, %v1084_v19  ;;  %v491_v63 = vmul.f32 %v1072_v16, %v1047_v2 }
  0x2b   : > { %v670_v61 = vadd.f32 %v1139_v11, %v655_v54  ;;  %v607_v62 = vsel %vm603_vm0, 0.0, %v590_v56  ;;  %v512_v5 = vmul.f32 %v1074_v17, %v1052_v3  ;;  %v677_v6 = vmul.f32 0.5, %v669_v37 }
  0x2c   : > { %v574_v7 = vadd.f32 %v566_v53, %v553_v58  ;;  %v443_v8 = vadd.f32 %v435_v59, %v421_v57  ;;  %v533_v9 = vmul.f32 %v1070_v15, %v1089_v20  ;;  %v615_v23 = vadd.f32 %v607_v62, %v519_v55 }
  0x2d   : > { %v686_v21 = vmul.f32 0.70710677, %v670_v61  ;;  %v499_v24 = vadd.f32 %v491_v63, %v478_v60  ;;  %v546_v25 = vmul.f32 %v1072_v16, %v1057_v4  ;;  %v567_v28 = vmul.f32 %v1074_v17, %v1066_v13 }
  0x2e   : > { %v631_v26 = vrot.slane %v574_v7, 1  ;;  %v465_v27 = vadd.f32 %v457_v14, %v443_v8  ;;  %v422_v29 = vmul.f32 %v1072_v16, %v1079_v18  ;;  %v436_v15 = vmul.f32 %v1074_v17, %v1029_v0 }
  0x2f   : > { %940 = verf.f32 %v686_v21  ;;  %v520_v30 = vadd.f32 %v512_v5, %v499_v24  ;;  %v554_v31 = vadd.f32 %v546_v25, %v533_v9  ;;  %v458_v34 = vmul.f32 %v1092_v22, %v1034_v1 }
  0x30   : > { %v648_v32 = vsel %vm644_vm1, %v631_v26, 0.0  ;;  %v591_v33 = vrot.slane %v465_v27, 7  ;;  %v479_v10 = vmul.f32 %v1072_v16, %v1084_v19  ;;  %v444_v38 = vadd.f32 %v436_v15, %v422_v29  ;;  %v389_v15 = vld [vmem:[%s367_s8] sm:$0xf] }
  0x31   : > { %v937_v35 = vpop.eup %936  ;;  %v656_v36 = vadd.f32 %v648_v32, %v615_v23  ;;  %v575_v37 = vadd.f32 %v567_v28, %v554_v31  ;;  %v492_v39 = vmul.f32 %v1074_v17, %v1047_v2  ;;  %v513_v44 = vmul.f32 %v1092_v22, %v1052_v3 }
  0x32   : > { %v939_v40 = vpop.eup %938  ;;  %v700_v42 = vadd.f32 1.0, %v937_v35  ;;  %v608_v43 = vsel %vm603_vm0, 0.0, %v591_v33  ;;  %v534_v46 = vmul.f32 %v1072_v16, %v1089_v20  ;;  %v466_v52 = vadd.f32 %v458_v34, %v444_v38 }
  0x33   : > { %v701_v47 = vadd.f32 1.0, %v939_v40  ;;  %v671_v48 = vadd.f32 %v1139_v11, %v656_v36  ;;  %v616_v49 = vadd.f32 %v608_v43, %v520_v30  ;;  %v632_v50 = vrot.slane %v575_v37, 1 }
  0x34   : > { %v708_v51 = vmul.f32 %v700_v42, %v676_v45  ;;  %v500_v12 = vadd.f32 %v492_v39, %v479_v10  ;;  %v547_v53 = vmul.f32 %v1074_v17, %v1057_v4  ;;  %v678_v55 = vmul.f32 0.5, %v670_v61 }
  0x35   : > { %v709_v54 = vmul.f32 %v701_v47, %v677_v6  ;;  %v687_v16 = vmul.f32 0.70710677, %v671_v48  ;;  %v649_v56 = vsel %vm644_vm1, %v632_v50, 0.0  ;;  %v568_v60 = vmul.f32 %v1092_v22, %v1066_v13 }
  0x36   : > { %v716_v57 = vpack.c.bf16 %v708_v51, %v708_v51  ;;  %v657_v45 = vadd.f32 %v649_v56, %v616_v49  ;;  %v521_v58 = vadd.f32 %v513_v44, %v500_v12  ;;  %v555_v59 = vadd.f32 %v547_v53, %v534_v46 }
  0x37   : > { %v717_v14 = vpack.c.bf16 %v709_v54, %v709_v54  ;;  %942 = verf.f32 %v687_v16  ;;  %v592_v62 = vrot.slane %v466_v52, 7  ;;  %v423_v61 = vmul.f32 %v1074_v17, %v1079_v18 }
  0x38   : > { %725 = vst.msk [vmem:[%s1216_s30] sm:$0xf] %vm724_vm2, %v716_v57  ;;  %v672_v63 = vadd.f32 %v1139_v11, %v657_v45  ;;  %v437_v5 = vmul.f32 %v1092_v22, %v1029_v0  ;;  %v459_v6 = vmul.f32 %v1162_v41, %v1034_v1  ;;  %v576_v8 = vadd.f32 %v568_v60, %v555_v59 }
  0x39   : > { %v941_v7 = vpop.eup %940  ;;  %726 = vst.msk [vmem:[%s1216_s30 + $0x4] sm:$0xf] %vm724_vm2, %v717_v14  ;;  %v609_v9 = vsel %vm603_vm0, 0.0, %v592_v62  ;;  %v480_v21 = vmul.f32 %v1074_v17, %v1084_v19  ;;  %v493_v23 = vmul.f32 %v1092_v22, %v1047_v2  ;;  %v679_v25 = vmul.f32 0.5, %v671_v48 }
  0x3a   : > { %v702_v24 = vadd.f32 1.0, %v941_v7  ;;  %v688_v26 = vmul.f32 0.70710677, %v672_v63  ;;  %v617_v27 = vadd.f32 %v609_v9, %v521_v58  ;;  %v633_v28 = vrot.slane %v576_v8, 1 }
  0x3b   : > { %v445_v29 = vadd.f32 %v437_v5, %v423_v61  ;;  %v501_v30 = vadd.f32 %v493_v23, %v480_v21  ;;  %v514_v31 = vmul.f32 %v1162_v41, %v1052_v3  ;;  %v535_v33 = vmul.f32 %v1074_v17, %v1089_v20 }
  0x3c   : > { %v710_v32 = vmul.f32 %v702_v24, %v678_v55  ;;  %944 = verf.f32 %v688_v26  ;;  %v548_v34 = vmul.f32 %v1092_v22, %v1057_v4  ;;  %v650_v10 = vsel %vm644_vm1, %v633_v28, 0.0 }
  0x3d   : > { %v467_v35 = vadd.f32 %v459_v6, %v445_v29  ;;  %v522_v36 = vadd.f32 %v514_v31, %v501_v30  ;;  %v569_v37 = vmul.f32 %v1162_v41, %v1066_v13  ;;  %v658_v39 = vadd.f32 %v650_v10, %v617_v27 }
  0x3e   : > { %v718_v38 = vpack.c.bf16 %v710_v32, %v710_v32  ;;  %v556_v40 = vadd.f32 %v548_v34, %v535_v33  ;;  %v390_v42 = vunpack.c.l.bf16 %v389_v15  ;;  %v424_v44 = vmul.f32 %v1092_v22, %v1079_v18 }
  0x3f   : > { %v593_v43 = vrot.slane %v467_v35, 7  ;;  %v438_v17 = vmul.f32 %v1162_v41, %v1029_v0  ;;  %v481_v46 = vmul.f32 %v1092_v22, %v1084_v19  ;;  %v673_v47 = vadd.f32 %v1139_v11, %v658_v39 }
  0x40   : > { %727 = vst.msk [vmem:[%s1216_s30 + $0x8] sm:$0xf] %vm724_vm2, %v718_v38  ;;  %v577_v48 = vadd.f32 %v569_v37, %v556_v40  ;;  %v395_v49 = vmul.f32 0.0, %v390_v42  ;;  %v494_v50 = vmul.f32 %v1162_v41, %v1047_v2  ;;  %v536_v18 = vmul.f32 %v1092_v22, %v1089_v20 }
  0x41   : > { %v943_v51 = vpop.eup %942  ;;  %v610_v52 = vsel %vm603_vm0, 0.0, %v593_v43  ;;  %v446_v12 = vadd.f32 %v438_v17, %v424_v44  ;;  %v549_v0 = vmul.f32 %v1162_v41, %v1057_v4  ;;  %v689_v53 = vmul.f32 0.70710677, %v673_v47 }
  0x42   : > { %v703_v19 = vadd.f32 1.0, %v943_v51  ;;  %v618_v54 = vadd.f32 %v610_v52, %v522_v36  ;;  %v634_v55 = vrot.slane %v577_v48, 1  ;;  %v460_v16 = vmul.f32 %v1034_v1, %v395_v49 }
  0x43   : > { %v502_v56 = vadd.f32 %v494_v50, %v481_v46  ;;  %v515_v2 = vmul.f32 %v1052_v3, %v395_v49  ;;  %946 = verf.f32 %v689_v53  ;;  %v557_v45 = vadd.f32 %v549_v0, %v536_v18 }
  0x44   : > { %v711_v57 = vmul.f32 %v703_v19, %v679_v25  ;;  %v570_v58 = vmul.f32 %v1066_v13, %v395_v49  ;;  %v680_v59 = vmul.f32 0.5, %v672_v63  ;;  %v651_v20 = vsel %vm644_vm1, %v634_v55, 0.0 }
  0x45   : > { %v468_v22 = vadd.f32 %v460_v16, %v446_v12  ;;  %v659_v14 = vadd.f32 %v651_v20, %v618_v54  ;;  %v523_v60 = vadd.f32 %v515_v2, %v502_v56  ;;  %v681_v23 = vmul.f32 0.5, %v673_v47 }
  0x46   : > { %v945_v4 = vpop.eup %944  ;;  %v719_v41 = vpack.c.bf16 %v711_v57, %v711_v57  ;;  %v578_v62 = vadd.f32 %v570_v58, %v557_v45 }
  0x47   : > { %v704_v1 = vadd.f32 1.0, %v945_v4  ;;  %v594_v61 = vrot.slane %v468_v22, 7  ;;  %v674_v3 = vadd.f32 %v1139_v11, %v659_v14 }
  0x48   : > { %728 = vst.msk [vmem:[%s1216_s30 + $0xc] sm:$0xf] %vm724_vm2, %v719_v41  ;;  %v635_v5 = vrot.slane %v578_v62, 1 }
  0x49   : > { %v712_v6 = vmul.f32 %v704_v1, %v680_v59  ;;  %v611_v13 = vsel %vm603_vm0, 0.0, %v594_v61  ;;  %v690_v63 = vmul.f32 0.70710677, %v674_v3  ;;  %v682_v30 = vmul.f32 0.5, %v674_v3 }
  0x4a   : > { %v619_v7 = vadd.f32 %v611_v13, %v523_v60  ;;  %v652_v8 = vsel %vm644_vm1, %v635_v5, 0.0 }
  0x4b   : > { %v720_v9 = vpack.c.bf16 %v712_v6, %v712_v6  ;;  %948 = verf.f32 %v690_v63 }
  0x4c   : > { %v660_v21 = vadd.f32 %v652_v8, %v619_v7 }
  0x4d   : > { %729 = vst.msk [vmem:[%s1216_s30 + $0x10] sm:$0xf] %vm724_vm2, %v720_v9  ;;  %v947_v24 = vpop.eup %946 }
  0x4e   : > { %v675_v25 = vadd.f32 %v1139_v11, %v660_v21  ;;  %v705_v26 = vadd.f32 1.0, %v947_v24 }
  0x50   : > { %v691_v27 = vmul.f32 0.70710677, %v675_v25  ;;  %v713_v28 = vmul.f32 %v705_v26, %v681_v23  ;;  %v683_v34 = vmul.f32 0.5, %v675_v25 }
  0x52   : > { %950 = verf.f32 %v691_v27  ;;  %v721_v29 = vpack.c.bf16 %v713_v28, %v713_v28 }
  0x54   : > { %730 = vst.msk [vmem:[%s1216_s30 + $0x14] sm:$0xf] %vm724_vm2, %v721_v29 }
  0x55   : > { %v949_v31 = vpop.eup %948 }
  0x56   : > { %v706_v15 = vadd.f32 1.0, %v949_v31 }
  0x58   : > { %v714_v32 = vmul.f32 %v706_v15, %v682_v30 }
  0x5a   : > { %v722_v33 = vpack.c.bf16 %v714_v32, %v714_v32 }
  0x5c   : > { %v951_v10 = vpop.eup %950  ;;  %731 = vst.msk [vmem:[%s1216_s30 + $0x18] sm:$0xf] %vm724_vm2, %v722_v33 }
  0x5d   : > { %v707_v35 = vadd.f32 1.0, %v951_v10 }
  0x5f   : > { %v715_v36 = vmul.f32 %v707_v35, %v683_v34 }
  0x61   : > { %v723_v11 = vpack.c.bf16 %v715_v36, %v715_v36 }
  0x63   : > { %732 = vst.msk [vmem:[%s1216_s30 + $0x1c] sm:$0xf] %vm724_vm2, %v723_v11 }
  0x64 PF: > { %s15_s20 = sadd.s32 1, %s974_s20   ;;  %s1299_s18 = smov %s970_s19 }
  0x65   : > { %p12_p5 = scmp.ge.s32.totalorder %s15_s20, 4   ;;  %s1300_s19 = smov %s1302_s21 }
  0x67   :  { %14 = sbr.rel (!%p12_p5) target bundleno = 2 (0x2), region = 78 }

</bundles_post_ra>
